<compile_context>
chip_gen: v7x
topology: tpu7x:2x2x1
jax: 0.10.0
libtpu: 0.0.40
codegen_flags: <defaults>
</compile_context>

<pallas_src>
import jax
import jax.numpy as jnp
from jax.experimental import pallas as pl
from jax.experimental.pallas import tpu as pltpu

LANE = 128  # lane-dense output slab width


def policy_net_kernel(obs_ref, w1_ref, b1_ref, w2t_ref, b2_ref, out_ref):
    """softmax(relu(obs @ W1 + b1) @ W2 + b2) on VPU/XLU/EUP only (no MXU)."""
    bt, k_in = obs_ref.shape          # (batch tile, obs_size)
    n_act = w2t_ref.shape[0]          # action count A
    pad = out_ref.shape[1]            # lane-padded output width (128)

    x = obs_ref[...]                  # (BT, K) f32

    # ---- fc1 + bias as K broadcast-FMAs on the VPU, then ReLU -------------
    h = x[:, 0:1] * w1_ref[0:1, :] + b1_ref[...]       # (BT, H)
    for k in range(1, k_in):                           # static unroll, K tiny
        h = h + x[:, k:k + 1] * w1_ref[k:k + 1, :]
    h = jnp.maximum(h, 0.0)

    # ---- fc2 as per-action lane reductions (XLU) --------------------------
    logits = []
    for a in range(n_act):
        dot_a = jnp.sum(h * w2t_ref[a:a + 1, :], axis=-1, keepdims=True)  # (BT,1)
        logits.append(dot_a + b2_ref[a:a + 1, :])                         # + b2[a]

    # ---- numerically-stable softmax over the A per-row scalars ------------
    m = logits[0]
    for a in range(1, n_act):
        m = jnp.maximum(m, logits[a])
    exps = [jnp.exp(l - m) for l in logits]            # EUP
    denom = exps[0]
    for a in range(1, n_act):
        denom = denom + exps[a]
    inv = 1.0 / denom                                  # exact: probs sum to 1
    probs = [e * inv for e in exps]                    # each (BT, 1)

    # ---- lane-dense store: probs in lanes [0, A), zeros elsewhere ----------
    lane = jax.lax.broadcasted_iota(jnp.int32, (bt, pad), 1)
    out = jnp.zeros((bt, pad), jnp.float32)
    for a in range(n_act):
        out = jnp.where(lane == a, probs[a], out)
    out_ref[...] = out                                 # full-width, unmasked vst


def policy_network_forward(obs, w1, b1, w2, b2, *, batch_tile=512):
    """obs: (B, obs_size); w1: (obs_size, H); b1: (H,); w2: (H, A); b2: (A,)."""
    B, obs_size = obs.shape
    H = w1.shape[1]
    A = w2.shape[1]

    b1_2d = b1.reshape(1, H)
    w2t = jnp.transpose(w2)           # (A, H): each action's weights lane-aligned
    b2_2d = b2.reshape(A, 1)

    # Batch-tile only; weights stay VMEM-resident across the grid.  Tiles are
    # small (<= 512 x 128 f32 slabs) so they fit every generation's VMEM
    # budget, including v7x's 64 MiB.
    bt = B if B <= batch_tile else batch_tile
    if B % bt != 0:
        bt = B                        # fall back to a single full-batch block
    grid = (B // bt,)

    flops = 2 * B * (obs_size * H + H * A)
    bytes_accessed = 4 * (B * obs_size + obs_size * H + H + H * A + A + B * LANE)

    out_padded = pl.pallas_call(
        policy_net_kernel,
        out_shape=jax.ShapeDtypeStruct((B, LANE), jnp.float32),
        grid=grid,
        in_specs=[
            pl.BlockSpec((bt, obs_size), lambda i: (i, 0)),   # obs streams
            pl.BlockSpec((obs_size, H), lambda i: (0, 0)),    # W1 resident
            pl.BlockSpec((1, H), lambda i: (0, 0)),           # b1 resident
            pl.BlockSpec((A, H), lambda i: (0, 0)),           # W2^T resident
            pl.BlockSpec((A, 1), lambda i: (0, 0)),           # b2 resident
        ],
        out_specs=pl.BlockSpec((bt, LANE), lambda i: (i, 0)),
        compiler_params=pltpu.CompilerParams(
            dimension_semantics=("parallel",)),               # 2 TCs on v7x
        cost_estimate=pl.CostEstimate(
            flops=flops,
            transcendentals=B * A,
            bytes_accessed=bytes_accessed),
    )(obs, w1, b1_2d, w2t, b2_2d)

    # TODO(synk): fuse categorical sampling (pltpu.prng_random_bits) into the
    # kernel epilogue for the RL loop so probs never round-trip through HBM.
    return out_padded[:, :A]


def init_params(key, obs_size, hidden, action_size):
    """Deterministic PyTorch-style Linear init (uniform(-1/sqrt(fan_in), ...))."""
    k1, k2, k3, k4 = jax.random.split(key, 4)
    bound1 = 1.0 / jnp.sqrt(jnp.float32(obs_size))
    bound2 = 1.0 / jnp.sqrt(jnp.float32(hidden))
    # stored already transposed as (in, out)
    w1 = jax.random.uniform(k1, (obs_size, hidden), jnp.float32, -bound1, bound1)
    b1 = jax.random.uniform(k2, (hidden,), jnp.float32, -bound1, bound1)
    w2 = jax.random.uniform(k3, (hidden, action_size), jnp.float32, -bound2, bound2)
    b2 = jax.random.uniform(k4, (action_size,), jnp.float32, -bound2, bound2)
    return w1, b1, w2, b2


if __name__ == "__main__":
    # CartPole-like env: obs_size=4, action_size=2; hidden=128 per the module.
    batch, obs_size, hidden, action_size = 8, 4, 128, 2

    key = jax.random.PRNGKey(0)
    k_obs, k_params = jax.random.split(key)
    obs = jax.random.normal(k_obs, (batch, obs_size), dtype=jnp.float32)
    w1, b1, w2, b2 = init_params(k_params, obs_size, hidden, action_size)

    probs = policy_network_forward(obs, w1, b1, w2, b2)
    probs = jax.block_until_ready(probs)

    # sanity check against pure-JAX reference
    h_ref = jnp.maximum(obs @ w1 + b1, 0.0)
    ref = jax.nn.softmax(h_ref @ w2 + b2, axis=-1)
    assert probs.shape == (batch, action_size)
    assert jnp.max(jnp.abs(probs - ref)) < 1e-4, "mismatch vs reference"
    assert jnp.max(jnp.abs(jnp.sum(probs, axis=-1) - 1.0)) < 1e-4

    print("KERNEL_OK")
</pallas_src>

<mosaic_0001>
module attributes {stable_mosaic.version = 11 : i64} {
  func.func @policy_net_kernel(%arg0: i32, %arg1: memref<8x4xf32, #tpu.memory_space<vmem>>, %arg2: memref<4x128xf32, #tpu.memory_space<vmem>>, %arg3: memref<1x128xf32, #tpu.memory_space<vmem>>, %arg4: memref<2x128xf32, #tpu.memory_space<vmem>>, %arg5: memref<2x1xf32, #tpu.memory_space<vmem>>, %arg6: memref<8x128xf32, #tpu.memory_space<vmem>>) attributes {dimension_semantics = [#tpu.dimension_semantics<parallel>], iteration_bounds = array<i64: 1>, scalar_prefetch = 0 : i64, scratch_operands = 0 : i64, tpu.core_type = #tpu.core_type<tc>, window_params = [{transform_indices = @transform_0, window_bounds = array<i64: 8, 4>}, {pipeline_mode = #tpu.pipeline_mode<synchronous>, transform_indices = @transform_1, window_bounds = array<i64: 4, 128>}, {pipeline_mode = #tpu.pipeline_mode<synchronous>, transform_indices = @transform_2, window_bounds = array<i64: 1, 128>}, {pipeline_mode = #tpu.pipeline_mode<synchronous>, transform_indices = @transform_3, window_bounds = array<i64: 2, 128>}, {pipeline_mode = #tpu.pipeline_mode<synchronous>, transform_indices = @transform_4, window_bounds = array<i64: 2, 1>}, {transform_indices = @transform_5, window_bounds = array<i64: 8, 128>}]} {
    %c0 = arith.constant 0 : index
    %c0_0 = arith.constant 0 : index
    %0 = vector.load %arg1[%c0, %c0_0] : memref<8x4xf32, #tpu.memory_space<vmem>>, vector<8x4xf32>
    %1 = vector.extract_strided_slice %0 {offsets = [0, 0], sizes = [8, 1], strides = [1, 1]} : vector<8x4xf32> to vector<8x1xf32>
    %c0_1 = arith.constant 0 : index
    %c0_2 = arith.constant 0 : index
    %2 = vector.load %arg2[%c0_1, %c0_2] : memref<4x128xf32, #tpu.memory_space<vmem>>, vector<1x128xf32>
    %3 = vector.broadcast %1 : vector<8x1xf32> to vector<8x128xf32>
    %4 = vector.broadcast %2 : vector<1x128xf32> to vector<8x128xf32>
    %5 = arith.mulf %3, %4 : vector<8x128xf32>
    %c0_3 = arith.constant 0 : index
    %c0_4 = arith.constant 0 : index
    %6 = vector.load %arg3[%c0_3, %c0_4] : memref<1x128xf32, #tpu.memory_space<vmem>>, vector<1x128xf32>
    %7 = vector.broadcast %6 : vector<1x128xf32> to vector<8x128xf32>
    %8 = arith.addf %5, %7 : vector<8x128xf32>
    %9 = vector.extract_strided_slice %0 {offsets = [0, 1], sizes = [8, 1], strides = [1, 1]} : vector<8x4xf32> to vector<8x1xf32>
    %c1 = arith.constant 1 : index
    %c0_5 = arith.constant 0 : index
    %10 = vector.load %arg2[%c1, %c0_5] : memref<4x128xf32, #tpu.memory_space<vmem>>, vector<1x128xf32>
    %11 = vector.broadcast %9 : vector<8x1xf32> to vector<8x128xf32>
    %12 = vector.broadcast %10 : vector<1x128xf32> to vector<8x128xf32>
    %13 = arith.mulf %11, %12 : vector<8x128xf32>
    %14 = arith.addf %8, %13 : vector<8x128xf32>
    %15 = vector.extract_strided_slice %0 {offsets = [0, 2], sizes = [8, 1], strides = [1, 1]} : vector<8x4xf32> to vector<8x1xf32>
    %c2 = arith.constant 2 : index
    %c0_6 = arith.constant 0 : index
    %16 = vector.load %arg2[%c2, %c0_6] : memref<4x128xf32, #tpu.memory_space<vmem>>, vector<1x128xf32>
    %17 = vector.broadcast %15 : vector<8x1xf32> to vector<8x128xf32>
    %18 = vector.broadcast %16 : vector<1x128xf32> to vector<8x128xf32>
    %19 = arith.mulf %17, %18 : vector<8x128xf32>
    %20 = arith.addf %14, %19 : vector<8x128xf32>
    %21 = vector.extract_strided_slice %0 {offsets = [0, 3], sizes = [8, 1], strides = [1, 1]} : vector<8x4xf32> to vector<8x1xf32>
    %c3 = arith.constant 3 : index
    %c0_7 = arith.constant 0 : index
    %22 = vector.load %arg2[%c3, %c0_7] : memref<4x128xf32, #tpu.memory_space<vmem>>, vector<1x128xf32>
    %23 = vector.broadcast %21 : vector<8x1xf32> to vector<8x128xf32>
    %24 = vector.broadcast %22 : vector<1x128xf32> to vector<8x128xf32>
    %25 = arith.mulf %23, %24 : vector<8x128xf32>
    %26 = arith.addf %20, %25 : vector<8x128xf32>
    %cst = arith.constant 0.000000e+00 : f32
    %27 = vector.broadcast %cst : f32 to vector<8x128xf32>
    %28 = arith.maximumf %26, %27 : vector<8x128xf32>
    %c0_8 = arith.constant 0 : index
    %c0_9 = arith.constant 0 : index
    %29 = vector.load %arg4[%c0_8, %c0_9] : memref<2x128xf32, #tpu.memory_space<vmem>>, vector<1x128xf32>
    %30 = vector.broadcast %29 : vector<1x128xf32> to vector<8x128xf32>
    %31 = arith.mulf %28, %30 : vector<8x128xf32>
    %cst_10 = arith.constant dense<0.000000e+00> : vector<8xf32>
    %32 = vector.multi_reduction <add>, %31, %cst_10 [1] : vector<8x128xf32> to vector<8xf32>
    %33 = vector.shape_cast %32 : vector<8xf32> to vector<8x1xf32>
    %c0_11 = arith.constant 0 : index
    %c0_12 = arith.constant 0 : index
    %34 = vector.load %arg5[%c0_11, %c0_12] : memref<2x1xf32, #tpu.memory_space<vmem>>, vector<1x1xf32>
    %35 = vector.broadcast %34 : vector<1x1xf32> to vector<8x1xf32>
    %36 = arith.addf %33, %35 : vector<8x1xf32>
    %c1_13 = arith.constant 1 : index
    %c0_14 = arith.constant 0 : index
    %37 = vector.load %arg4[%c1_13, %c0_14] : memref<2x128xf32, #tpu.memory_space<vmem>>, vector<1x128xf32>
    %38 = vector.broadcast %37 : vector<1x128xf32> to vector<8x128xf32>
    %39 = arith.mulf %28, %38 : vector<8x128xf32>
    %cst_15 = arith.constant dense<0.000000e+00> : vector<8xf32>
    %40 = vector.multi_reduction <add>, %39, %cst_15 [1] : vector<8x128xf32> to vector<8xf32>
    %41 = vector.shape_cast %40 : vector<8xf32> to vector<8x1xf32>
    %c1_16 = arith.constant 1 : index
    %c0_17 = arith.constant 0 : index
    %42 = vector.load %arg5[%c1_16, %c0_17] : memref<2x1xf32, #tpu.memory_space<vmem>>, vector<1x1xf32>
    %43 = vector.broadcast %42 : vector<1x1xf32> to vector<8x1xf32>
    %44 = arith.addf %41, %43 : vector<8x1xf32>
    %45 = arith.maximumf %36, %44 : vector<8x1xf32>
    %46 = arith.subf %36, %45 : vector<8x1xf32>
    %47 = math.exp %46 : vector<8x1xf32>
    %48 = arith.subf %44, %45 : vector<8x1xf32>
    %49 = math.exp %48 : vector<8x1xf32>
    %50 = arith.addf %47, %49 : vector<8x1xf32>
    %cst_18 = arith.constant 1.000000e+00 : f32
    %51 = vector.broadcast %cst_18 : f32 to vector<8x1xf32>
    %52 = arith.divf %51, %50 : vector<8x1xf32>
    %53 = arith.mulf %47, %52 : vector<8x1xf32>
    %54 = arith.mulf %49, %52 : vector<8x1xf32>
    %55 = tpu.iota {dimensions = array<i32: 1>} : vector<8x128xi32>
    %cst_19 = arith.constant 0.000000e+00 : f32
    %56 = vector.broadcast %cst_19 : f32 to vector<8x128xf32>
    %c0_i32 = arith.constant 0 : i32
    %57 = vector.broadcast %c0_i32 : i32 to vector<8x128xi32>
    %58 = arith.cmpi eq, %55, %57 : vector<8x128xi32>
    %59 = vector.shape_cast %53 : vector<8x1xf32> to vector<8x1xf32>
    %60 = vector.broadcast %59 : vector<8x1xf32> to vector<8x128xf32>
    %61 = arith.select %58, %60, %56 : vector<8x128xi1>, vector<8x128xf32>
    %c1_i32 = arith.constant 1 : i32
    %62 = vector.broadcast %c1_i32 : i32 to vector<8x128xi32>
    %63 = arith.cmpi eq, %55, %62 : vector<8x128xi32>
    %64 = vector.shape_cast %54 : vector<8x1xf32> to vector<8x1xf32>
    %65 = vector.broadcast %64 : vector<8x1xf32> to vector<8x128xf32>
    %66 = arith.select %63, %65, %61 : vector<8x128xi1>, vector<8x128xf32>
    %c0_20 = arith.constant 0 : index
    %c0_21 = arith.constant 0 : index
    %67 = vector.load %arg6[%c0_20, %c0_21] : memref<8x128xf32, #tpu.memory_space<vmem>>, vector<8x128xf32>
    tpu.vector_store %arg6[%c0_20, %c0_21], %66 {strides = array<i32>} : memref<8x128xf32, #tpu.memory_space<vmem>>, vector<8x128xf32>,
    return
  }
  func.func @transform_0(%arg0: i32) -> (i32, i32) {
    %c0_i32 = arith.constant 0 : i32
    %c0_i32_0 = arith.constant 0 : i32
    return %arg0, %c0_i32 : i32, i32
  }
  func.func @transform_1(%arg0: i32) -> (i32, i32) {
    %c0_i32 = arith.constant 0 : i32
    %c0_i32_0 = arith.constant 0 : i32
    %c0_i32_1 = arith.constant 0 : i32
    return %c0_i32, %c0_i32_0 : i32, i32
  }
  func.func @transform_2(%arg0: i32) -> (i32, i32) {
    %c0_i32 = arith.constant 0 : i32
    %c0_i32_0 = arith.constant 0 : i32
    %c0_i32_1 = arith.constant 0 : i32
    return %c0_i32, %c0_i32_0 : i32, i32
  }
  func.func @transform_3(%arg0: i32) -> (i32, i32) {
    %c0_i32 = arith.constant 0 : i32
    %c0_i32_0 = arith.constant 0 : i32
    %c0_i32_1 = arith.constant 0 : i32
    return %c0_i32, %c0_i32_0 : i32, i32
  }
  func.func @transform_4(%arg0: i32) -> (i32, i32) {
    %c0_i32 = arith.constant 0 : i32
    %c0_i32_0 = arith.constant 0 : i32
    %c0_i32_1 = arith.constant 0 : i32
    return %c0_i32, %c0_i32_0 : i32, i32
  }
  func.func @transform_5(%arg0: i32) -> (i32, i32) {
    %c0_i32 = arith.constant 0 : i32
    %c0_i32_0 = arith.constant 0 : i32
    return %arg0, %c0_i32 : i32, i32
  }
}

</mosaic_0001>

<bundles_post_ra>
// kernel: tpu_custom_call.1
= control target key start
LH: loop header
LB: loop body
LE: loop exit
PB: predicated region body
PF: predicated region fallthrough
CT: control target
= control target key end

     0   :  { %v196_v1 = vmov 0   ;;  %v197_v2 = vmov 2   ;;  %s273_s0 = inlined_call_operand.vmem [shape: f32[8,4], index: 0, kind: input, shape index: {}]   ;;  %s274_s1 = inlined_call_operand.vmem [shape: f32[4,128], index: 1, kind: input, shape index: {}]   ;;  %s275_s2 = inlined_call_operand.vmem [shape: f32[1,128], index: 2, kind: input, shape index: {}]   ;;  %s276_s3 = inlined_call_operand.vmem [shape: f32[2,128], index: 3, kind: input, shape index: {}]   ;;  %s277_s4 = inlined_call_operand.vmem [shape: f32[2,1], index: 4, kind: input, shape index: {}]   ;;  %s278_s5 = inlined_call_operand.hbm [shape: f32[8,128], index: 5, kind: output, shape index: {}]  }
   0x1   :  { %v21_v0 = vld [vmem:[%s273_s0] sm:$0xff]  ;;  %160 = vset.pattern.permute.xlu0 %v196_v1  ;;  %162 = vset.pattern.permute.xlu1 %v197_v2 }
   0x2   :  { %10 = vsyncpa [#allocation3], 0  ;;  %25 = vperm.xlu0 %160, %v21_v0   ;;  %54 = vperm.xlu1 %162, %v21_v0   ;;  %v198_v3 = vmov 1   ;;  %v199_v4 = vmov 3   ;;  %v146_v5 = vld [vmem:[%s274_s1] ss:$0 sm:$0xff]  ;;  %v115_v44 = vlaneseq }
   0x3   :  { %v147_v9 = vld [vmem:[%s275_s2] ss:$0 sm:$0xff]  ;;  %v148_v10 = vld [vmem:[%s274_s1 + $0x1] ss:$0 sm:$0xff]  ;;  %v149_v11 = vld [vmem:[%s274_s1 + $0x2] ss:$0 sm:$0xff] }
   0x4   :  { %v150_v13 = vld [vmem:[%s274_s1 + $0x3] ss:$0 sm:$0xff]  ;;  %v153_v22 = vld [vmem:[%s276_s3 + $0x1] ss:$0 sm:$0xff]  ;;  %v151_v23 = vld [vmem:[%s276_s3] ss:$0 sm:$0xff] }
   0x5   :  { %v154_v27 = vld [vmem:[%s277_s4 + $0x1] ss:$0 sm:$0xff]  ;;  %v152_v28 = vld [vmem:[%s277_s4] ss:$0 sm:$0xff]  ;;  %v116_v45 = vand.u32 127, %v115_v44  ;;  %s200_s3 = smov [#allocation2]  }
   0x6   :  { %161 = vset.pattern.permute.xlu0 %v198_v3  ;;  %163 = vset.pattern.permute.xlu1 %v199_v4  ;;  %s138_s4 = sshll.u32 %s200_s3, 4  ;;  %s139_s4 = int_to_ptr.vmem [resolvable:$true] %s138_s4 }
   0x7   :  { %43 = vperm.xlu0 %161, %v21_v0   ;;  %65 = vperm.xlu1 %163, %v21_v0   ;;  %vm117_vm0 = vcmp.eq.s32.totalorder %v116_v45, 0  ;;  %vm124_vm1 = vcmp.eq.s32.totalorder %v116_v45, 1  ;;  %s172_s10 = scalar_lea.vmem %s139_s4, 128  ;;  %p177_p1 = scmp.lt.s32.totalorder %s139_s4, %s139_s4 }
   0x8   :  { %p173_p0 = scmp.ne.s32.totalorder %s139_s4, %s172_s10  ;;  %p178_p2 = scmp.lt.s32.totalorder %s172_s10, %s172_s10 }
   0xa   :  { %p179_p3 = por %p178_p2, %p177_p1 }
   0xb   :  { %165 = vset.pattern.permute.xlu1 %v196_v1  ;;  %164 = vset.pattern.permute.xlu0 %v196_v1 }
   0xc   :  { %p180_p4 = pnand %p179_p3, %p173_p0 }
  0x81   :  { %v26_v6 = vpop.permute.xlu0 %25  ;;  %v55_v7 = vpop.permute.xlu1 %54 }
  0x82   :  { %v32_v8 = vmul.f32 %v146_v5, %v26_v6  ;;  %v61_v17 = vmul.f32 %v149_v11, %v55_v7 }
  0x84   :  { %v40_v15 = vadd.f32 %v147_v9, %v32_v8 }
  0x86   :  { %v44_v12 = vpop.permute.xlu0 %43  ;;  %v66_v14 = vpop.permute.xlu1 %65 }
  0x87   :  { %v50_v16 = vmul.f32 %v148_v10, %v44_v12  ;;  %v72_v19 = vmul.f32 %v150_v13, %v66_v14 }
  0x89   :  { %v51_v18 = vadd.f32 %v50_v16, %v40_v15 }
  0x8b   :  { %v62_v20 = vadd.f32 %v61_v17, %v51_v18 }
  0x8d   :  { %v73_v21 = vadd.f32 %v72_v19, %v62_v20 }
  0x8f   :  { %v74_v24 = vmax.f32 %v73_v21, 0.0 }
  0x91   :  { %v94_v25 = vmul.f32 %v153_v22, %v74_v24  ;;  %v80_v26 = vmul.f32 %v151_v23, %v74_v24 }
  0x93   :  { %95 = vadd.xlane.f32.xlu0 %v94_v25  ;;  %81 = vadd.xlane.f32.xlu1 %v80_v26 }
 0x120   :  { %v96_v29 = vpop.xlane.xlu0 %95  ;;  %v82_v30 = vpop.xlane.xlu1 %81 }
 0x121   :  { %v102_v31 = vadd.f32 %v154_v27, %v96_v29  ;;  %v88_v32 = vadd.f32 %v152_v28, %v82_v30 }
 0x123   :  { %v103_v33 = vmax.f32 %v88_v32, %v102_v31 }
 0x125   :  { %v104_v34 = vsub.f32 %v88_v32, %v103_v33  ;;  %v107_v35 = vsub.f32 %v102_v31, %v103_v33 }
 0x127   :  { %v105_v36 = vmul.f32 1.442695, %v104_v34  ;;  %v108_v37 = vmul.f32 1.442695, %v107_v35 }
 0x129   :  { %166 = vpow2.f32 %v105_v36 }
 0x12a   :  { %168 = vpow2.f32 %v108_v37 }
 0x133   :  { %v167_v38 = vpop.eup %166 }
 0x134   :  { %v169_v39 = vpop.eup %168 }
 0x135   :  { %v110_v40 = vadd.f32 %v169_v39, %v167_v38 }
 0x137   :  { %170 = vrcp.f32 %v110_v40 }
 0x141   :  { %v171_v41 = vpop.eup %170 }
 0x142   :  { %v114_v42 = vmul.f32 %v171_v41, %v169_v39  ;;  %v113_v43 = vmul.f32 %v171_v41, %v167_v38 }
 0x144   :  { %127 = vperm.xlu1 %165, %v114_v42   ;;  %120 = vperm.xlu0 %164, %v113_v43  }
 0x1c3   :  { %v128_v46 = vpop.permute.xlu1 %127  ;;  %v121_v47 = vpop.permute.xlu0 %120 }
 0x1c4   :  { %v123_v48 = vsel %vm117_vm0, %v121_v47, 0.0 }
 0x1c5   :  { %v130_v49 = vsel %vm124_vm1, %v128_v46, %v123_v48 }
 0x1c6   :  { %131 = vst [vmem:[#allocation2] sm:$0xff] %v130_v49 }
 0x1c7   :  { %183 = shalt.err (!%p180_p4)
}
 0x1c8   :  { %s184_s13 = scalar_lea.hbm %s278_s5, 128 }
 0x1c9   :  { %p185_p5 = scmp.ne.s32.totalorder %s278_s5, %s184_s13  ;;  %p188_p6 = scmp.lt.u32.totalorder %s184_s13, %s278_s5 }
 0x1cb   :  { %p190_p7 = pnand %p188_p6, %p185_p5 }
 0x1cd   :  { %193 = shalt.err (!%p190_p7)
}
 0x1ce   :  { %141 = dma.vmem_to_hbm [thread:$0]  %s139_s4, 128, %s278_s5, [#allocation3]  }
 0x1cf   :  { %194 = dma.done.wait [#allocation3], 128  }
 0x1d0   :  { %195 = vsyncadd [#allocation3], 4294967168 }
 0x1d1   :  { %145 = vsyncpa [#allocation3], 1 }

</bundles_post_ra>
